<compile_context>
chip_gen: v6e
topology: v6e:2x2x1
jax: 0.10.0
libtpu: 0.0.40
codegen_flags: <defaults>
</compile_context>

<pallas_src>
import jax
import jax.numpy as jnp
from jax import lax
from jax.experimental import pallas as pl
from jax.experimental.pallas import tpu as pltpu


def _round_up(x, m):
    return (x + m - 1) // m * m


def textclass_kernel(tok_ref, bag_ref, cnt_ref, emb_ref, w_ref, b_ref,
                     out_ref, acc_ref):
    """Grid = (num_bag_tiles, num_token_tiles); token axis is the reduction.

    tok_ref : (TT, 1)        int32  token ids of this token tile
    bag_ref : (1, TT)        int32  bag (segment) id of each token, -1 = pad
    cnt_ref : (TB, 1)        f32    tokens per bag for this bag tile
    emb_ref : (V_pad, D_pad) bf16   embedding table (VMEM resident)
    w_ref   : (D_pad, C_pad) f32    transposed FC weight
    b_ref   : (1, C_pad)     f32    FC bias
    out_ref : (TB, C_pad)    f32    output tile (written on last token tile)
    acc_ref : (TB, D_pad)    f32    per-bag embedding-sum accumulator
    """
    j = pl.program_id(1)

    @pl.when(j == 0)
    def _():
        acc_ref[...] = jnp.zeros_like(acc_ref)

    TT = tok_ref.shape[0]
    TB = acc_ref.shape[0]
    V = emb_ref.shape[0]

    toks = tok_ref[...]                                   # (TT, 1) int32
    bags = bag_ref[...]                                   # (1, TT) int32

    # Gather-as-matmul: one-hot(tokens) @ table  -> embedding rows, f32 accum.
    onehot = (toks == lax.broadcasted_iota(jnp.int32, (TT, V), 1)
              ).astype(emb_ref.dtype)                     # (TT, V)
    rows = jnp.dot(onehot, emb_ref[...],
                   preferred_element_type=jnp.float32)    # (TT, D_pad)

    # Bag-selection matrix for this bag tile: sel[b, t] = 1 iff token t
    # belongs to bag (tile_start + b).  Padding tokens carry bag id -1.
    first_bag = pl.program_id(0) * TB
    bag_iota = first_bag + lax.broadcasted_iota(jnp.int32, (TB, TT), 0)
    sel = (bags == bag_iota).astype(jnp.float32)          # (TB, TT)

    acc_ref[...] += jnp.dot(sel, rows,
                            preferred_element_type=jnp.float32)  # (TB, D_pad)

    @pl.when(j == pl.num_programs(1) - 1)
    def _():
        cnt = jnp.maximum(cnt_ref[...], 1.0)              # empty bag -> zeros
        inv = pl.reciprocal(cnt, approx=False)            # approx=True = EUP fast path
        mean = acc_ref[...] * inv                         # (TB, D_pad)
        logits = jnp.dot(mean, w_ref[...].astype(jnp.float32),
                         preferred_element_type=jnp.float32) + b_ref[...]
        out_ref[...] = logits.astype(out_ref.dtype)


def text_classification_forward(text, offsets, emb_table, fc_w_t, fc_b,
                                *, bag_tile=128, tok_tile=128):
    """text: (T,) int token ids, offsets: (B,) int bag starts (PyTorch
    EmbeddingBag convention), emb_table: (V, D) (f32 or bf16),
    fc_w_t: (D, C) = fc.weight.T, fc_b: (C,).  Returns (B, C) f32 logits."""
    T = int(text.shape[0])
    B = int(offsets.shape[0])
    V, D = emb_table.shape
    C = fc_w_t.shape[1]

    TB = min(bag_tile, _round_up(B, 8))
    TT = tok_tile
    B_pad = _round_up(B, TB)
    T_pad = _round_up(max(T, 1), TT)
    V_pad = _round_up(V, 128)
    D_pad = _round_up(D, 128)
    C_pad = _round_up(C, 128)

    # --- ragged (text, offsets) -> dense metadata (layout plumbing, O(T+B)) ---
    offsets_i = offsets.astype(jnp.int32)
    ends = jnp.concatenate([offsets_i[1:], jnp.array([T], jnp.int32)])
    counts = (ends - offsets_i).astype(jnp.float32)                    # (B,)

    pos = jnp.arange(T_pad, dtype=jnp.int32)
    bag_ids = (jnp.searchsorted(offsets_i, pos, side='right')
               .astype(jnp.int32) - 1)
    bag_ids = jnp.where(pos < T, bag_ids, jnp.int32(-1))               # pad -> -1

    tok_pad = jnp.zeros((T_pad,), jnp.int32).at[:T].set(text.astype(jnp.int32))
    tok_col = tok_pad.reshape(T_pad, 1)                                # (T_pad, 1)
    bag_row = bag_ids.reshape(1, T_pad)                                # (1, T_pad)
    cnt_col = jnp.zeros((B_pad, 1), jnp.float32).at[:B, 0].set(counts)

    emb_p = jnp.zeros((V_pad, D_pad), emb_table.dtype).at[:V, :D].set(emb_table)
    w_p = jnp.zeros((D_pad, C_pad), jnp.float32).at[:D, :C].set(
        fc_w_t.astype(jnp.float32))
    b_p = jnp.zeros((1, C_pad), jnp.float32).at[0, :C].set(
        fc_b.reshape(-1).astype(jnp.float32))

    grid = (B_pad // TB, T_pad // TT)

    out = pl.pallas_call(
        textclass_kernel,
        out_shape=jax.ShapeDtypeStruct((B_pad, C_pad), jnp.float32),
        grid_spec=pltpu.PrefetchScalarGridSpec(
            num_scalar_prefetch=0,
            grid=grid,
            in_specs=[
                pl.BlockSpec((TT, 1), lambda i, j: (j, 0)),         # tokens
                pl.BlockSpec((1, TT), lambda i, j: (0, j)),         # bag ids
                pl.BlockSpec((TB, 1), lambda i, j: (i, 0)),         # counts
                pl.BlockSpec((V_pad, D_pad), lambda i, j: (0, 0)),  # emb table
                pl.BlockSpec((D_pad, C_pad), lambda i, j: (0, 0)),  # fc weight
                pl.BlockSpec((1, C_pad), lambda i, j: (0, 0)),      # fc bias
            ],
            out_specs=pl.BlockSpec((TB, C_pad), lambda i, j: (i, 0)),
            scratch_shapes=[pltpu.VMEM((TB, D_pad), jnp.float32)],
        ),
        compiler_params=pltpu.CompilerParams(
            dimension_semantics=("parallel", "arbitrary"),
            vmem_limit_bytes=32 * 1024 * 1024,   # safe on v5e/v6e/v7x; raise for big tables
        ),
    )(tok_col, bag_row, cnt_col, emb_p, w_p, b_p)

    return out[:B, :C]


if __name__ == "__main__":
    # Small synthetic setup consistent with the module's __init__.
    vocab_size = 64
    embed_dim = 32
    num_class = 4
    batch = 2
    total_tokens = 12

    key = jax.random.PRNGKey(0)
    k_emb, k_w, k_txt = jax.random.split(key, 3)

    init_range = 0.5
    emb_table_f32 = jax.random.uniform(
        k_emb, (vocab_size, embed_dim), jnp.float32,
        minval=-init_range, maxval=init_range)
    fc_w = jax.random.uniform(
        k_w, (num_class, embed_dim), jnp.float32,
        minval=-init_range, maxval=init_range)
    fc_w_t = fc_w.T                                   # (embed_dim, num_class)
    fc_b = jnp.zeros((num_class,), jnp.float32)       # fc.bias zeroed

    # Flattened token ids + per-bag offsets (EmbeddingBag convention).
    text = jax.random.randint(k_txt, (total_tokens,), 0, vocab_size, jnp.int32)
    offsets = jnp.array([0, 5], dtype=jnp.int32)      # bag0: [0:5], bag1: [5:12]

    # Store the (bandwidth-dominant) embedding table in bf16; FC stays f32.
    emb_table = emb_table_f32.astype(jnp.bfloat16)

    fwd = jax.jit(lambda t, o, e, w, b: text_classification_forward(t, o, e, w, b))
    out = jax.block_until_ready(fwd(text, offsets, emb_table, fc_w_t, fc_b))

    # Pure-JAX reference (EmbeddingBag mean + Linear) using the same bf16 table.
    emb_view = emb_table.astype(jnp.float32)
    ends = jnp.concatenate([offsets[1:], jnp.array([total_tokens], jnp.int32)])
    rows = []
    for i in range(batch):
        toks = text[int(offsets[i]):int(ends[i])]
        mean = jnp.mean(emb_view[toks], axis=0)
        rows.append(mean @ fc_w_t + fc_b)
    ref = jnp.stack(rows)

    assert out.shape == (batch, num_class)
    assert jnp.allclose(out, ref, atol=1e-4, rtol=1e-4), (out, ref)
    print("KERNEL_OK")
</pallas_src>

<mosaic_0001>
module attributes {stable_mosaic.version = 11 : i64} {
  func.func @textclass_kernel(%arg0: i32, %arg1: i32, %arg2: memref<128x1xi32, #tpu.memory_space<vmem>>, %arg3: memref<1x128xi32, #tpu.memory_space<vmem>>, %arg4: memref<8x1xf32, #tpu.memory_space<vmem>>, %arg5: memref<128x128xbf16, #tpu.memory_space<vmem>>, %arg6: memref<128x128xf32, #tpu.memory_space<vmem>>, %arg7: memref<1x128xf32, #tpu.memory_space<vmem>>, %arg8: memref<8x128xf32, #tpu.memory_space<vmem>>, %arg9: memref<8x128xf32, #tpu.memory_space<vmem>>) attributes {dimension_semantics = [#tpu.dimension_semantics<parallel>, #tpu.dimension_semantics<arbitrary>], iteration_bounds = array<i64: 1, 1>, scalar_prefetch = 0 : i64, scratch_operands = 1 : i64, tpu.core_type = #tpu.core_type<tc>, window_params = [{transform_indices = @transform_0, window_bounds = array<i64: 128, 1>}, {transform_indices = @transform_1, window_bounds = array<i64: 1, 128>}, {transform_indices = @transform_2, window_bounds = array<i64: 8, 1>}, {pipeline_mode = #tpu.pipeline_mode<synchronous>, transform_indices = @transform_3, window_bounds = array<i64: 128, 128>}, {pipeline_mode = #tpu.pipeline_mode<synchronous>, transform_indices = @transform_4, window_bounds = array<i64: 128, 128>}, {pipeline_mode = #tpu.pipeline_mode<synchronous>, transform_indices = @transform_5, window_bounds = array<i64: 1, 128>}, {transform_indices = @transform_6, window_bounds = array<i64: 8, 128>}]} {
    %c0_i32 = arith.constant 0 : i32
    %0 = arith.cmpi eq, %arg1, %c0_i32 : i32
    %1 = arith.extui %0 : i1 to i32
    %c0_i32_0 = arith.constant 0 : i32
    %2 = arith.cmpi ne, %1, %c0_i32_0 : i32
    scf.if %2 {
      %cst_13 = arith.constant 0.000000e+00 : f32
      %28 = vector.broadcast %cst_13 : f32 to vector<8x128xf32>
      %c0_14 = arith.constant 0 : index
      %c0_15 = arith.constant 0 : index
      %29 = vector.load %arg9[%c0_14, %c0_15] : memref<8x128xf32, #tpu.memory_space<vmem>>, vector<8x128xf32>
      tpu.vector_store %arg9[%c0_14, %c0_15], %28 {strides = array<i32>} : memref<8x128xf32, #tpu.memory_space<vmem>>, vector<8x128xf32>,
    } else {
    }
    %c0 = arith.constant 0 : index
    %c0_1 = arith.constant 0 : index
    %3 = vector.load %arg2[%c0, %c0_1] : memref<128x1xi32, #tpu.memory_space<vmem>>, vector<128x1xi32>
    %c0_2 = arith.constant 0 : index
    %c0_3 = arith.constant 0 : index
    %4 = vector.load %arg3[%c0_2, %c0_3] : memref<1x128xi32, #tpu.memory_space<vmem>>, vector<1x128xi32>
    %5 = tpu.iota {dimensions = array<i32: 1>} : vector<128x128xi32>
    %6 = vector.broadcast %3 : vector<128x1xi32> to vector<128x128xi32>
    %7 = arith.cmpi eq, %6, %5 : vector<128x128xi32>
    %8 = arith.extui %7 : vector<128x128xi1> to vector<128x128xi32>
    %9 = arith.sitofp %8 : vector<128x128xi32> to vector<128x128xf32>
    %10 = arith.truncf %9 : vector<128x128xf32> to vector<128x128xbf16>
    %c0_4 = arith.constant 0 : index
    %c0_5 = arith.constant 0 : index
    %11 = vector.load %arg5[%c0_4, %c0_5] : memref<128x128xbf16, #tpu.memory_space<vmem>>, vector<128x128xbf16>
    %cst = arith.constant dense<0.000000e+00> : vector<128x128xf32>
    %12 = tpu.matmul %10, %11, %cst {dimension_numbers = #tpu.dot_dimension_numbers<[1], [0], [0], [1], [0, 0, 1, 1], [], []>} : vector<128x128xbf16>, vector<128x128xbf16>, vector<128x128xf32> -> vector<128x128xf32>
    %c8_i32 = arith.constant 8 : i32
    %13 = arith.muli %arg0, %c8_i32 : i32
    %14 = tpu.iota {dimensions = array<i32: 0>} : vector<8x128xi32>
    %15 = vector.broadcast %13 : i32 to vector<8x128xi32>
    %16 = arith.addi %15, %14 : vector<8x128xi32>
    %17 = vector.broadcast %4 : vector<1x128xi32> to vector<8x128xi32>
    %18 = arith.cmpi eq, %17, %16 : vector<8x128xi32>
    %19 = arith.extui %18 : vector<8x128xi1> to vector<8x128xi32>
    %20 = arith.sitofp %19 : vector<8x128xi32> to vector<8x128xf32>
    %c0_6 = arith.constant 0 : index
    %c0_7 = arith.constant 0 : index
    %21 = vector.load %arg9[%c0_6, %c0_7] : memref<8x128xf32, #tpu.memory_space<vmem>>, vector<8x128xf32>
    %cst_8 = arith.constant dense<0.000000e+00> : vector<8x128xf32>
    %22 = tpu.matmul %20, %12, %cst_8 {dimension_numbers = #tpu.dot_dimension_numbers<[1], [0], [0], [1], [0, 0, 1, 1], [], []>} : vector<8x128xf32>, vector<128x128xf32>, vector<8x128xf32> -> vector<8x128xf32>
    %23 = arith.addf %21, %22 : vector<8x128xf32>
    %c0_9 = arith.constant 0 : index
    %c0_10 = arith.constant 0 : index
    %24 = vector.load %arg9[%c0_9, %c0_10] : memref<8x128xf32, #tpu.memory_space<vmem>>, vector<8x128xf32>
    tpu.vector_store %arg9[%c0_9, %c0_10], %23 {strides = array<i32>} : memref<8x128xf32, #tpu.memory_space<vmem>>, vector<8x128xf32>,
    %c0_i32_11 = arith.constant 0 : i32
    %25 = arith.cmpi eq, %arg1, %c0_i32_11 : i32
    %26 = arith.extui %25 : i1 to i32
    %c0_i32_12 = arith.constant 0 : i32
    %27 = arith.cmpi ne, %26, %c0_i32_12 : i32
    scf.if %27 {
      %c0_13 = arith.constant 0 : index
      %c0_14 = arith.constant 0 : index
      %28 = vector.load %arg4[%c0_13, %c0_14] : memref<8x1xf32, #tpu.memory_space<vmem>>, vector<8x1xf32>
      %cst_15 = arith.constant 1.000000e+00 : f32
      %29 = vector.broadcast %cst_15 : f32 to vector<8x1xf32>
      %30 = arith.maximumf %28, %29 : vector<8x1xf32>
      %31 = tpu.reciprocal %30 : vector<8x1xf32> -> vector<8x1xf32>
      %c0_16 = arith.constant 0 : index
      %c0_17 = arith.constant 0 : index
      %32 = vector.load %arg9[%c0_16, %c0_17] : memref<8x128xf32, #tpu.memory_space<vmem>>, vector<8x128xf32>
      %33 = vector.broadcast %31 : vector<8x1xf32> to vector<8x128xf32>
      %34 = arith.mulf %32, %33 : vector<8x128xf32>
      %c0_18 = arith.constant 0 : index
      %c0_19 = arith.constant 0 : index
      %35 = vector.load %arg6[%c0_18, %c0_19] : memref<128x128xf32, #tpu.memory_space<vmem>>, vector<128x128xf32>
      %cst_20 = arith.constant dense<0.000000e+00> : vector<8x128xf32>
      %36 = tpu.matmul %34, %35, %cst_20 {dimension_numbers = #tpu.dot_dimension_numbers<[1], [0], [0], [1], [0, 0, 1, 1], [], []>} : vector<8x128xf32>, vector<128x128xf32>, vector<8x128xf32> -> vector<8x128xf32>
      %c0_21 = arith.constant 0 : index
      %c0_22 = arith.constant 0 : index
      %37 = vector.load %arg7[%c0_21, %c0_22] : memref<1x128xf32, #tpu.memory_space<vmem>>, vector<1x128xf32>
      %38 = vector.broadcast %37 : vector<1x128xf32> to vector<8x128xf32>
      %39 = arith.addf %36, %38 : vector<8x128xf32>
      %c0_23 = arith.constant 0 : index
      %c0_24 = arith.constant 0 : index
      %40 = vector.load %arg8[%c0_23, %c0_24] : memref<8x128xf32, #tpu.memory_space<vmem>>, vector<8x128xf32>
      tpu.vector_store %arg8[%c0_23, %c0_24], %39 {strides = array<i32>} : memref<8x128xf32, #tpu.memory_space<vmem>>, vector<8x128xf32>,
    } else {
    }
    return
  }
  func.func @transform_0(%arg0: i32, %arg1: i32) -> (i32, i32) {
    %c0_i32 = arith.constant 0 : i32
    %c0_i32_0 = arith.constant 0 : i32
    return %arg1, %c0_i32 : i32, i32
  }
  func.func @transform_1(%arg0: i32, %arg1: i32) -> (i32, i32) {
    %c0_i32 = arith.constant 0 : i32
    %c0_i32_0 = arith.constant 0 : i32
    return %c0_i32, %arg1 : i32, i32
  }
  func.func @transform_2(%arg0: i32, %arg1: i32) -> (i32, i32) {
    %c0_i32 = arith.constant 0 : i32
    %c0_i32_0 = arith.constant 0 : i32
    return %arg0, %c0_i32 : i32, i32
  }
  func.func @transform_3(%arg0: i32, %arg1: i32) -> (i32, i32) {
    %c0_i32 = arith.constant 0 : i32
    %c0_i32_0 = arith.constant 0 : i32
    %c0_i32_1 = arith.constant 0 : i32
    return %c0_i32, %c0_i32_0 : i32, i32
  }
  func.func @transform_4(%arg0: i32, %arg1: i32) -> (i32, i32) {
    %c0_i32 = arith.constant 0 : i32
    %c0_i32_0 = arith.constant 0 : i32
    %c0_i32_1 = arith.constant 0 : i32
    return %c0_i32, %c0_i32_0 : i32, i32
  }
  func.func @transform_5(%arg0: i32, %arg1: i32) -> (i32, i32) {
    %c0_i32 = arith.constant 0 : i32
    %c0_i32_0 = arith.constant 0 : i32
    %c0_i32_1 = arith.constant 0 : i32
    return %c0_i32, %c0_i32_0 : i32, i32
  }
  func.func @transform_6(%arg0: i32, %arg1: i32) -> (i32, i32) {
    %c0_i32 = arith.constant 0 : i32
    %c0_i32_0 = arith.constant 0 : i32
    return %arg0, %c0_i32 : i32, i32
  }
}

</mosaic_0001>

<bundles_post_ra>
// kernel: custom-call.1
= control target key start
LH: loop header
LB: loop body
LE: loop exit
PB: predicated region body
PF: predicated region fallthrough
CT: control target
= control target key end

     0   :  { %s6_s0 = inlined_call_operand.vmem [shape: u32[128], index: 0, kind: output, shape index: {}]  }

// kernel: _lambda_.1
= control target key start
LH: loop header
LB: loop body
LE: loop exit
PB: predicated region body
PF: predicated region fallthrough
CT: control target
= control target key end

     0   :  { %v722_v0 = vmov 0   ;;  %v46_v28 = vlaneseq  ;;  %v723_v34 = vmov 1.0|1.0   ;;  %v724_v47 = vmov 0.0   ;;  %s930_s0 = inlined_call_operand.vmem [shape: s32[128,1], index: 0, kind: input, shape index: {}]   ;;  %s931_s3 = inlined_call_operand.vmem [shape: bf16[128,128], index: 3, kind: input, shape index: {}]   ;;  %s932_s2 = inlined_call_operand.vmem [shape: f32[8,1], index: 2, kind: input, shape index: {}]   ;;  %s933_s4 = inlined_call_operand.vmem [shape: f32[128,128], index: 4, kind: input, shape index: {}]   ;;  %s934_s1 = inlined_call_operand.vmem [shape: s32[1,128], index: 1, kind: input, shape index: {}]   ;;  %s935_s5 = inlined_call_operand.vmem [shape: f32[1,128], index: 5, kind: input, shape index: {}]   ;;  %s936_s6 = inlined_call_operand.vmem [shape: f32[8,128], index: 6, kind: output, shape index: {}]  }
   0x1   :  { %711 = vset.pattern.permute.xlu1 %v722_v0  ;;  %710 = vset.pattern.permute.xlu0 %v722_v0  ;;  %v31_v1 = vld [vmem:[%s930_s0 + $0x10] sm:$0xff]  ;;  %v29_v2 = vld [vmem:[%s930_s0] sm:$0xff]  ;;  %v32_v3 = vld [vmem:[%s930_s0 + $0x18] sm:$0xff] }
   0x2   :  { %55 = vperm.xlu1 %711, %v31_v1   ;;  %49 = vperm.xlu0 %710, %v29_v2   ;;  %v30_v4 = vld [vmem:[%s930_s0 + $0x8] sm:$0xff]  ;;  %v33_v6 = vld [vmem:[%s930_s0 + $0x20] sm:$0xff]  ;;  %v712_v7 = vld [vmem:[%s931_s3 + $0x38] sm:$0xff]   ;;  %v47_v31 = vand.u32 127, %v46_v28 }
   0x3   :  { %v34_v5 = vld [vmem:[%s930_s0 + $0x28] sm:$0xff]  ;;  %v713_v8 = vld [vmem:[%s931_s3 + $0x30] sm:$0xff]   ;;  %v36_v9 = vld [vmem:[%s930_s0 + $0x38] sm:$0xff]  ;;  %603 = vmatprep.subr.bf16.mxu0 %v712_v7  ;;  %635 = vmatprep.subr.mxu1 %v724_v47 }
   0x4   :  { %v35_v10 = vld [vmem:[%s930_s0 + $0x30] sm:$0xff]  ;;  %v401_v11 = vld [vmem:[%s932_s2] sm:$0xff]  ;;  %604 = vmatpush3.bf16.msra.mxu0 %v712_v7  ;;  %v714_v12 = vld [vmem:[%s931_s3 + $0x28] sm:$0xff]  }
   0x5   :  { %605 = vmatprep.subr.bf16.mxu0 %v713_v8  ;;  %v402_v13 = vmax.f32 %v401_v11, 1.0  ;;  %v38_v14 = vld [vmem:[%s930_s0 + $0x48] sm:$0xff]  ;;  %v37_v15 = vld [vmem:[%s930_s0 + $0x40] sm:$0xff]  ;;  %v40_v17 = vld [vmem:[%s930_s0 + $0x58] sm:$0xff] }
   0x6   :  { %58 = vperm.xlu1 %711, %v32_v3   ;;  %52 = vperm.xlu0 %710, %v30_v4   ;;  %v715_v16 = vld [vmem:[%s931_s3 + $0x20] sm:$0xff]   ;;  %v39_v18 = vld [vmem:[%s930_s0 + $0x50] sm:$0xff]  ;;  %v716_v19 = vld [vmem:[%s931_s3 + $0x18] sm:$0xff]  }
   0x7   :  { %720 = vrcp.f32 %v402_v13  ;;  %v42_v20 = vld [vmem:[%s930_s0 + $0x68] sm:$0xff]  ;;  %v41_v21 = vld [vmem:[%s930_s0 + $0x60] sm:$0xff]  ;;  %v717_v22 = vld [vmem:[%s931_s3 + $0x10] sm:$0xff]  }
   0x8   :  { %606 = vmatpush3.bf16.msra.mxu0 %v713_v8  ;;  %v44_v23 = vld [vmem:[%s930_s0 + $0x78] sm:$0xff]  ;;  %v43_v24 = vld [vmem:[%s930_s0 + $0x70] sm:$0xff]  ;;  %v718_v25 = vld [vmem:[%s931_s3 + $0x8] sm:$0xff]  }
   0x9   :  { %607 = vmatprep.subr.bf16.mxu0 %v714_v12  ;;  %v719_v27 = vld [vmem:[%s931_s3] sm:$0xff]   ;;  %v426_v48 = vld [vmem:[%s933_s4 + $0x78] sm:$0xff]  ;;  %v425_v49 = vld [vmem:[%s933_s4 + $0x70] sm:$0xff] }
   0xa   :  { %64 = vperm.xlu1 %711, %v34_v5   ;;  %61 = vperm.xlu0 %710, %v33_v6   ;;  %v424_v50 = vld [vmem:[%s933_s4 + $0x68] sm:$0xff]  ;;  %v423_v51 = vld [vmem:[%s933_s4 + $0x60] sm:$0xff]  ;;  %v422_v52 = vld [vmem:[%s933_s4 + $0x58] sm:$0xff] }
   0xb   :  { %v421_v53 = vld [vmem:[%s933_s4 + $0x50] sm:$0xff]  ;;  %v420_v54 = vld [vmem:[%s933_s4 + $0x48] sm:$0xff]  ;;  %v419_v55 = vld [vmem:[%s933_s4 + $0x40] sm:$0xff] }
   0xc   :  { %608 = vmatpush3.bf16.msra.mxu0 %v714_v12  ;;  %v418_v56 = vld [vmem:[%s933_s4 + $0x38] sm:$0xff]  ;;  %v417_v57 = vld [vmem:[%s933_s4 + $0x30] sm:$0xff]  ;;  %v416_v58 = vld [vmem:[%s933_s4 + $0x28] sm:$0xff] }
   0xd   :  { %609 = vmatprep.subr.bf16.mxu0 %v715_v16  ;;  %v415_v59 = vld [vmem:[%s933_s4 + $0x20] sm:$0xff]  ;;  %v414_v60 = vld [vmem:[%s933_s4 + $0x18] sm:$0xff]  ;;  %v413_v61 = vld [vmem:[%s933_s4 + $0x10] sm:$0xff] }
   0xe   :  { %70 = vperm.xlu1 %711, %v36_v9   ;;  %67 = vperm.xlu0 %710, %v35_v10   ;;  %v412_v62 = vld [vmem:[%s933_s4 + $0x8] sm:$0xff] }
  0x10   :  { %610 = vmatpush3.bf16.msra.mxu0 %v715_v16  ;;  %v549_v16 = vld [vmem:[%s934_s1] ss:$0 sm:$0xff] }
  0x11   :  { %611 = vmatprep.subr.bf16.mxu0 %v716_v19 }
  0x12   :  { %76 = vperm.xlu1 %711, %v38_v14   ;;  %73 = vperm.xlu0 %710, %v37_v15   ;;  %v315_v15 = vshrl.u32 %v46_v28, 7 }
  0x14   :  { %612 = vmatpush3.bf16.msra.mxu0 %v716_v19  ;;  %v721_v26 = vpop.eup %720 }
  0x15   :  { %613 = vmatprep.subr.bf16.mxu0 %v717_v22 }
  0x16   :  { %82 = vperm.xlu1 %711, %v40_v17   ;;  %79 = vperm.xlu0 %710, %v39_v18   ;;  %v726_v17 = vmov 1.0   ;;  %v411_v18 = vld [vmem:[%s933_s4] sm:$0xff] }
  0x18   :  { %614 = vmatpush3.bf16.msra.mxu0 %v717_v22 }
  0x19   :  { %615 = vmatprep.subr.bf16.mxu0 %v718_v25 }
  0x1a   :  { %88 = vperm.xlu1 %711, %v42_v20   ;;  %85 = vperm.xlu0 %710, %v41_v21  }
  0x1c   :  { %616 = vmatpush3.bf16.msra.mxu0 %v718_v25 }
  0x1d   :  { %617 = vmatprep.subr.bf16.mxu0 %v719_v27 }
  0x1e   :  { %94 = vperm.xlu1 %711, %v44_v23   ;;  %91 = vperm.xlu0 %710, %v43_v24   ;;  %v552_v23 = vld [vmem:[%s935_s5] ss:$0 sm:$0xff] }
  0x20   :  { %618 = vmatpush3.bf16.msra.mxu0 %v719_v27 }
  0x21   :  { %670 = vmatprep.subr.mxu0 %v724_v47 }
  0x22   :  { %407 = vperm.xlu0 %710, %v721_v26  }
  0x7d   :  { %v56_v29 = vpop.permute.xlu1 %55  ;;  %v50_v30 = vpop.permute.xlu0 %49 }
  0x7e   :  { %vm98_vm0 = vcmp.eq.s32.totalorder %v56_v29, %v47_v31  ;;  %vm96_vm3 = vcmp.eq.s32.totalorder %v50_v30, %v47_v31 }
  0x81   :  { %v59_v32 = vpop.permute.xlu1 %58  ;;  %v53_v33 = vpop.permute.xlu0 %52 }
  0x82   :  { %vm99_vm1 = vcmp.eq.s32.totalorder %v59_v32, %v47_v31  ;;  %vm97_vm2 = vcmp.eq.s32.totalorder %v53_v33, %v47_v31 }
  0x83   :  { %vm535_vm4 = vmpackc.low %vm99_vm1, %vm98_vm0 }
  0x84   :  { %vm533_vm5 = vmpackc.low %vm97_vm2, %vm96_vm3 }
  0x85   :  { %619 = vmatprep.mubr.msk.bf16.mxu0 %vm533_vm5, %v723_v34  ;;  %v65_v35 = vpop.permute.xlu1 %64  ;;  %v62_v36 = vpop.permute.xlu0 %61 }
  0x86   :  { %vm101_vm6 = vcmp.eq.s32.totalorder %v65_v35, %v47_v31  ;;  %620 = vmatmul.mubr.msk.bf16.vlgmr.msra.gmra.mxu0 %vm535_vm4, %v723_v34  ;;  %vm100_vm7 = vcmp.eq.s32.totalorder %v62_v36, %v47_v31 }
  0x87   :  { %vm537_vm8 = vmpackc.low %vm101_vm6, %vm100_vm7  ;;  %671 = vmatpush3.msra.mxu0 %v426_v48 }
  0x88   :  { %623 = vmatprep.mubr.msk.bf16.mxu0 %vm537_vm8, %v723_v34  ;;  %vm725_vm8 = vmmov 0   ;;  %672 = vmatprep.subr.mxu0 %v724_v47 }
  0x89   :  { %v71_v37 = vpop.permute.xlu1 %70  ;;  %v68_v38 = vpop.permute.xlu0 %67  ;;  %667 = vmatprep.mubr.msk.f32.mxu1 %vm725_vm8, %v724_v47  ;;  %673 = vmatpush3.msra.mxu0 %v425_v49 }
  0x8a   :  { %vm103_vm9 = vcmp.eq.s32.totalorder %v71_v37, %v47_v31  ;;  %vm102_vm10 = vcmp.eq.s32.totalorder %v68_v38, %v47_v31  ;;  %674 = vmatprep.subr.mxu0 %v724_v47 }
  0x8b   :  { %vm539_vm11 = vmpackc.low %vm103_vm9, %vm102_vm10  ;;  %675 = vmatpush3.msra.mxu0 %v424_v50  ;;  %vm322_vm9 = vcmp.eq.s32.totalorder %v549_v16, %v315_v15 }
  0x8c   :  { %676 = vmatprep.subr.mxu0 %v724_v47 }
  0x8d   :  { %v77_v39 = vpop.permute.xlu1 %76  ;;  %v74_v40 = vpop.permute.xlu0 %73  ;;  %677 = vmatpush3.msra.mxu0 %v423_v51 }
  0x8e   :  { %vm105_vm12 = vcmp.eq.s32.totalorder %v77_v39, %v47_v31  ;;  %624 = vmatmul.mubr.msk.bf16.gmra.mxu0 %vm539_vm11, %v723_v34  ;;  %vm104_vm13 = vcmp.eq.s32.totalorder %v74_v40, %v47_v31  ;;  %678 = vmatprep.subr.mxu0 %v724_v47 }
  0x8f   :  { %vm541_vm14 = vmpackc.low %vm105_vm12, %vm104_vm13  ;;  %679 = vmatpush3.msra.mxu0 %v422_v52 }
  0x90   :  { %627 = vmatprep.mubr.msk.bf16.mxu0 %vm541_vm14, %v723_v34  ;;  %680 = vmatprep.subr.mxu0 %v724_v47 }
  0x91   :  { %v83_v41 = vpop.permute.xlu1 %82  ;;  %v80_v42 = vpop.permute.xlu0 %79  ;;  %681 = vmatpush3.msra.mxu0 %v421_v53 }
  0x92   :  { %vm107_vm15 = vcmp.eq.s32.totalorder %v83_v41, %v47_v31  ;;  %vm106_vm0 = vcmp.eq.s32.totalorder %v80_v42, %v47_v31  ;;  %682 = vmatprep.subr.mxu0 %v724_v47 }
  0x93   :  { %vm543_vm1 = vmpackc.low %vm107_vm15, %vm106_vm0  ;;  %683 = vmatpush3.msra.mxu0 %v420_v54 }
  0x94   :  { %684 = vmatprep.subr.mxu0 %v724_v47 }
  0x95   :  { %v89_v43 = vpop.permute.xlu1 %88  ;;  %v86_v44 = vpop.permute.xlu0 %85  ;;  %685 = vmatpush3.msra.mxu0 %v419_v55 }
  0x96   :  { %vm109_vm2 = vcmp.eq.s32.totalorder %v89_v43, %v47_v31  ;;  %628 = vmatmul.mubr.msk.bf16.gmra.mxu0 %vm543_vm1, %v723_v34  ;;  %vm108_vm3 = vcmp.eq.s32.totalorder %v86_v44, %v47_v31  ;;  %686 = vmatprep.subr.mxu0 %v724_v47 }
  0x97   :  { %vm545_vm4 = vmpackc.low %vm109_vm2, %vm108_vm3  ;;  %687 = vmatpush3.msra.mxu0 %v418_v56 }
  0x98   :  { %631 = vmatprep.mubr.msk.bf16.mxu0 %vm545_vm4, %v723_v34  ;;  %688 = vmatprep.subr.mxu0 %v724_v47 }
  0x99   :  { %v95_v45 = vpop.permute.xlu1 %94  ;;  %v92_v46 = vpop.permute.xlu0 %91  ;;  %689 = vmatpush3.msra.mxu0 %v417_v57 }
  0x9a   :  { %vm111_vm5 = vcmp.eq.s32.totalorder %v95_v45, %v47_v31  ;;  %vm110_vm6 = vcmp.eq.s32.totalorder %v92_v46, %v47_v31  ;;  %690 = vmatprep.subr.mxu0 %v724_v47 }
  0x9b   :  { %vm547_vm7 = vmpackc.low %vm111_vm5, %vm110_vm6  ;;  %691 = vmatpush3.msra.mxu0 %v416_v58 }
  0x9c   :  { %692 = vmatprep.subr.mxu0 %v724_v47 }
  0x9d   :  { %693 = vmatpush3.msra.mxu0 %v415_v59  ;;  %v408_v19 = vpop.permute.xlu0 %407 }
  0x9e   :  { %632 = vmatmul.mubr.msk.bf16.gmra.mxu0 %vm547_vm7, %v723_v34  ;;  %694 = vmatprep.subr.mxu0 %v724_v47 }
  0x9f   :  { %702 = vmatprep.mubr.msk.f32.mxu0 %vm725_vm8, %v724_v47  ;;  %695 = vmatpush3.msra.mxu0 %v414_v60 }
  0xa0   :  { %696 = vmatprep.subr.mxu0 %v724_v47 }
  0xa1   :  { %697 = vmatpush3.msra.mxu0 %v413_v61 }
  0xa2   :  { %698 = vmatprep.subr.mxu0 %v724_v47 }
  0xa3   :  { %699 = vmatpush3.msra.mxu0 %v412_v62 }
  0xa4   :  { %700 = vmatprep.subr.mxu0 %v724_v47 }
  0xa5   :  { %701 = vmatpush3.msra.mxu0 %v411_v18 }
 0x146   :  { %v621_v63 = vpop.f32.mrf.mxu0 }
 0x148   :  { %v250_v0 = vpop.f32.mrf.mxu0 }
 0x14a   :  { %v622_v1 = vpop.f32.mrf.mxu0 }
 0x14c   :  { %v253_v2 = vpop.f32.mrf.mxu0 }
 0x14e   :  { %v625_v3 = vpop.f32.mrf.mxu0 }
 0x150   :  { %v266_v4 = vpop.f32.mrf.mxu0 }
 0x152   :  { %v626_v5 = vpop.f32.mrf.mxu0 }
 0x154   :  { %v269_v6 = vpop.f32.mrf.mxu0 }
 0x156   :  { %v629_v7 = vpop.f32.mrf.mxu0 }
 0x158   :  { %v282_v8 = vpop.f32.mrf.mxu0 }
 0x15a   :  { %v630_v9 = vpop.f32.mrf.mxu0 }
 0x15c   :  { %v285_v10 = vpop.f32.mrf.mxu0 }
 0x15e   :  { %v633_v11 = vpop.f32.mrf.mxu0 }
 0x160   :  { %v298_v12 = vpop.f32.mrf.mxu0 }
 0x162   :  { %v634_v13 = vpop.f32.mrf.mxu0 }
 0x163   :  { %636 = vmatpush3.msra.mxu1 %v634_v13 }
 0x164   :  { %637 = vmatprep.subr.mxu1 %v724_v47  ;;  %v301_v14 = vpop.f32.mrf.mxu0 }
 0x165   :  { %638 = vmatpush3.msra.mxu1 %v633_v11 }
 0x166   :  { %639 = vmatprep.subr.mxu1 %v724_v47 }
 0x167   :  { %640 = vmatpush3.msra.mxu1 %v301_v14 }
 0x168   :  { %641 = vmatprep.subr.mxu1 %v724_v47 }
 0x169   :  { %642 = vmatpush3.msra.mxu1 %v298_v12 }
 0x16a   :  { %643 = vmatprep.subr.mxu1 %v724_v47 }
 0x16b   :  { %644 = vmatpush3.msra.mxu1 %v630_v9 }
 0x16c   :  { %645 = vmatprep.subr.mxu1 %v724_v47 }
 0x16d   :  { %646 = vmatpush3.msra.mxu1 %v629_v7 }
 0x16e   :  { %647 = vmatprep.subr.mxu1 %v724_v47 }
 0x16f   :  { %648 = vmatpush3.msra.mxu1 %v285_v10 }
 0x170   :  { %649 = vmatprep.subr.mxu1 %v724_v47 }
 0x171   :  { %650 = vmatpush3.msra.mxu1 %v282_v8 }
 0x172   :  { %651 = vmatprep.subr.mxu1 %v724_v47 }
 0x173   :  { %652 = vmatpush3.msra.mxu1 %v626_v5 }
 0x174   :  { %653 = vmatprep.subr.mxu1 %v724_v47 }
 0x175   :  { %654 = vmatpush3.msra.mxu1 %v625_v3 }
 0x176   :  { %655 = vmatprep.subr.mxu1 %v724_v47 }
 0x177   :  { %656 = vmatpush3.msra.mxu1 %v269_v6 }
 0x178   :  { %657 = vmatprep.subr.mxu1 %v724_v47 }
 0x179   :  { %658 = vmatpush3.msra.mxu1 %v266_v4 }
 0x17a   :  { %659 = vmatprep.subr.mxu1 %v724_v47 }
 0x17b   :  { %660 = vmatpush3.msra.mxu1 %v622_v1 }
 0x17c   :  { %661 = vmatprep.subr.mxu1 %v724_v47 }
 0x17d   :  { %662 = vmatpush3.msra.mxu1 %v621_v63 }
 0x17e   :  { %663 = vmatprep.subr.mxu1 %v724_v47 }
 0x17f   :  { %664 = vmatpush3.msra.mxu1 %v253_v2 }
 0x180   :  { %665 = vmatprep.subr.mxu1 %v724_v47 }
 0x181   :  { %666 = vmatpush3.msra.mxu1 %v250_v0 }
 0x182   :  { %668 = vmatmul.mubr.msk.f32.vlgmr.msra.gmra.mxu1 %vm322_vm9, %v726_v17 }
 0x242   :  { %v392_v20 = vpop.f32.mrf.mxu1 }
 0x243   :  { %v410_v21 = vmul.f32 %v408_v19, %v392_v20 }
 0x244   :  { %v669_v22 = vpop.f32.mrf.mxu1 }
 0x245   :  { %703 = vmatmul.mubr.f32.vlgmr.msra.gmra.mxu0 %v410_v21 }
 0x305   :  { %v500_v24 = vpop.f32.mrf.mxu0 }
 0x306   :  { %v501_v25 = vadd.f32 %v552_v23, %v500_v24 }
 0x307   :  { %v704_v26 = vpop.f32.mrf.mxu0 }
 0x308   :  { %504 = vst [vmem:[%s936_s6] sm:$0xff] %v501_v25 }

</bundles_post_ra>
